<compile_context>
chip_gen: v6e
topology: v6e:2x2x1
jax: 0.10.0
libtpu: 0.0.40
codegen_flags: <defaults>
</compile_context>

<pallas_src>
import functools
from typing import NamedTuple

import jax
import jax.numpy as jnp
from jax.experimental import pallas as pl
from jax.experimental.pallas import tpu as pltpu


# ---------------------------------------------------------------------------
# Static geometry
# ---------------------------------------------------------------------------

class EncoderConfig(NamedTuple):
    cin: int
    c1: int
    c2: int
    k: int
    stride: int
    h: int
    w: int
    h1: int
    w1: int
    h2: int
    w2: int
    l1: int      # conv1 feature lanes (>= h1*w1, with slack for conv2 slices)
    l2: int      # conv2 "full-pitch" feature lanes = h2 * w1
    out_dim: int
    eps: float


def make_config(cin, c1, c2, k, stride, h, w, out_dim, eps=1e-5):
    h1 = (h - k) // stride + 1
    w1 = (w - k) // stride + 1
    h2 = h1 - k + 1                       # conv2: stride 1, VALID
    w2 = w1 - k + 1
    l2 = h2 * w1                          # full-pitch conv2 output length
    max_off = (k - 1) * w1 + (k - 1)      # largest conv2 tap offset
    l1 = max(h1 * w1, max_off + l2)       # every slice [off:off+l2] in range
    l1 = ((l1 + 7) // 8) * 8              # round up (tidy sublane tiling)
    return EncoderConfig(cin, c1, c2, k, stride, h, w,
                         h1, w1, h2, w2, l1, l2, out_dim, eps)


# ---------------------------------------------------------------------------
# Fused encoder kernel: conv1 + ReLU + conv2 + ReLU + Linear + LN + tanh
# (one batch element per grid step; everything stays in VMEM/vregs)
# ---------------------------------------------------------------------------

def _encoder_kernel(p_ref, w1_ref, b1_ref, w2_ref, b2_ref, wp_ref,
                    bp_ref, g_ref, bt_ref, o_ref, *, cfg):
    k, w1p, l2, c2 = cfg.k, cfg.w1, cfg.l2, cfg.c2
    cdt = w1_ref.dtype                     # compute dtype (f32 or bf16)

    # ---- conv1 (stride 2) as one GEMM over wrapper-gathered taps ----------
    # p_ref[0]: (Cin*k*k, L1), column p = ho1*W1 + wo1 (zero-padded tail).
    f1 = jnp.dot(w1_ref[...], p_ref[0], preferred_element_type=jnp.float32)
    f1 = jnp.maximum(f1 + b1_ref[...], 0.0).astype(cdt)          # (C1, L1)

    # ---- conv2 (stride 1, VALID) fused in-kernel: k*k shifted GEMMs -------
    # Full-pitch accumulation: output column p = ho2*W1 + wo2.  Columns with
    # wo2 >= W2 are junk; they are masked by zero rows in the projection
    # weight, so no select/relayout is ever needed.
    acc = jnp.zeros((c2, l2), jnp.float32)
    for i in range(k):
        for j in range(k):
            off = i * w1p + j
            acc = acc + jnp.dot(w2_ref[i * k + j], f1[:, off:off + l2],
                                preferred_element_type=jnp.float32)
    f2 = jnp.maximum(acc + b2_ref[...], 0.0).astype(cdt)          # (C2, L2)

    # ---- projection: Linear + LayerNorm + Tanh epilogue (all f32) ---------
    # flatten is folded into the weight layout (wp_ref is (C2, L2, out_dim)
    # with torch's NCHW flatten order baked in); contraction done per channel.
    h = bp_ref[...].astype(jnp.float32)                           # (1, out)
    for c in range(c2):
        h = h + jnp.dot(f2[c:c + 1, :], wp_ref[c],
                        preferred_element_type=jnp.float32)
    mu = jnp.mean(h, axis=-1, keepdims=True)
    var = jnp.mean(jnp.square(h - mu), axis=-1, keepdims=True)
    hn = (h - mu) * jax.lax.rsqrt(var + cfg.eps)
    o_ref[0] = jnp.tanh(hn * g_ref[...] + bt_ref[...]).astype(o_ref.dtype)


# ---------------------------------------------------------------------------
# One-time parameter preparation (hoisted out of the forward path)
# ---------------------------------------------------------------------------

def prepare_params(params, cfg, compute_dtype=jnp.float32):
    c1, c2, k, out_dim = cfg.c1, cfg.c2, cfg.k, cfg.out_dim

    # conv1 weight: (C1, Cin, k, k) -> (C1, Cin*k*k), rows match patch order.
    w1m = params["w1"].reshape(c1, cfg.cin * k * k).astype(compute_dtype)

    # conv2 weight: (C2, C1, k, k) -> (k*k, C2, C1), tap t = i*k + j.
    w2m = jnp.transpose(params["w2"], (2, 3, 0, 1)) \
             .reshape(k * k, c2, c1).astype(compute_dtype)

    # projection weight: torch flatten index is c*H2*W2 + ho2*W2 + wo2 on the
    # NCHW conv2 output.  Remap to the kernel's (c, ho2*W1 + wo2) full-pitch
    # layout and zero the junk columns wo2 >= W2 (this also masks the junk
    # f2 values, so no in-kernel select is needed).
    wp = params["wp"].reshape(c2, cfg.h2, cfg.w2, out_dim)
    wp = jnp.pad(wp, ((0, 0), (0, 0), (0, cfg.w1 - cfg.w2), (0, 0)))
    wpP = wp.reshape(c2, cfg.l2, out_dim).astype(compute_dtype)

    return {
        "w1m": w1m,
        "b1": params["b1"].reshape(c1, 1).astype(jnp.float32),
        "w2m": w2m,
        "b2": params["b2"].reshape(c2, 1).astype(jnp.float32),
        "wpP": wpP,
        "bp": params["bp"].reshape(1, out_dim).astype(jnp.float32),
        "gamma": params["gamma"].reshape(1, out_dim).astype(jnp.float32),
        "beta": params["beta"].reshape(1, out_dim).astype(jnp.float32),
    }


# ---------------------------------------------------------------------------
# Forward
# ---------------------------------------------------------------------------

def _conv1_patches(x, cfg):
    """(B, Cin, H, W) -> (B, Cin*k*k, L1) stride-`stride` patches of the RAW
    input (rows in (c, i, j) order, columns p = ho1*W1 + wo1, zero tail)."""
    B = x.shape[0]
    k, s, h1, w1 = cfg.k, cfg.stride, cfg.h1, cfg.w1
    taps = []
    for i in range(k):
        for j in range(k):
            taps.append(x[:, :, i:i + s * (h1 - 1) + 1:s,
                              j:j + s * (w1 - 1) + 1:s])          # (B,Cin,H1,W1)
    pat = jnp.stack(taps, axis=2)                                 # (B,Cin,k*k,H1,W1)
    pat = pat.reshape(B, cfg.cin * k * k, h1 * w1)
    return jnp.pad(pat, ((0, 0), (0, 0), (0, cfg.l1 - h1 * w1)))


@functools.partial(jax.jit, static_argnames=("cfg", "detach"))
def encoder_forward(prepped, x, *, cfg, detach=False):
    """Pallas forward of Encoder: projection(cnn(x)) in a single kernel."""
    # `detach` only changes gradients in the original module; the forward
    # values are identical, and this forward-only kernel defines no VJP.
    # TODO(synk): add a custom_vjp (honoring detach) if training is needed.
    del detach

    B = x.shape[0]
    cdt = prepped["w1m"].dtype
    patches = _conv1_patches(x, cfg).astype(cdt)                  # (B, Cin*k*k, L1)
    kk = cfg.cin * cfg.k * cfg.k

    out = pl.pallas_call(
        functools.partial(_encoder_kernel, cfg=cfg),
        out_shape=jax.ShapeDtypeStruct((B, 1, cfg.out_dim), jnp.float32),
        grid=(B,),
        in_specs=[
            pl.BlockSpec((1, kk, cfg.l1), lambda b: (b, 0, 0)),          # patches
            pl.BlockSpec((cfg.c1, kk), lambda b: (0, 0)),                # w1
            pl.BlockSpec((cfg.c1, 1), lambda b: (0, 0)),                 # b1
            pl.BlockSpec((cfg.k * cfg.k, cfg.c2, cfg.c1),
                         lambda b: (0, 0, 0)),                           # w2
            pl.BlockSpec((cfg.c2, 1), lambda b: (0, 0)),                 # b2
            pl.BlockSpec((cfg.c2, cfg.l2, cfg.out_dim),
                         lambda b: (0, 0, 0)),                           # wp
            pl.BlockSpec((1, cfg.out_dim), lambda b: (0, 0)),            # bp
            pl.BlockSpec((1, cfg.out_dim), lambda b: (0, 0)),            # gamma
            pl.BlockSpec((1, cfg.out_dim), lambda b: (0, 0)),            # beta
        ],
        out_specs=pl.BlockSpec((1, 1, cfg.out_dim), lambda b: (b, 0, 0)),
        compiler_params=pltpu.CompilerParams(
            dimension_semantics=("parallel",)),   # >=2 parallel steps on v7x
    )(patches, prepped["w1m"], prepped["b1"], prepped["w2m"], prepped["b2"],
      prepped["wpP"], prepped["bp"], prepped["gamma"], prepped["beta"])
    return out.reshape(B, cfg.out_dim)


# ---------------------------------------------------------------------------
# Pure-JAX reference matching the PyTorch module semantics
# ---------------------------------------------------------------------------

def encoder_reference(params, x, eps=1e-5):
    dn = ("NCHW", "OIHW", "NCHW")
    y = jax.lax.conv_general_dilated(x, params["w1"], (2, 2), "VALID",
                                     dimension_numbers=dn)
    y = jnp.maximum(y + params["b1"][None, :, None, None], 0.0)
    y = jax.lax.conv_general_dilated(y, params["w2"], (1, 1), "VALID",
                                     dimension_numbers=dn)
    y = jnp.maximum(y + params["b2"][None, :, None, None], 0.0)
    flat = y.reshape(y.shape[0], -1)                              # torch view(B,-1)
    h = flat @ params["wp"] + params["bp"]
    mu = h.mean(-1, keepdims=True)
    var = ((h - mu) ** 2).mean(-1, keepdims=True)
    hn = (h - mu) / jnp.sqrt(var + eps)
    return jnp.tanh(hn * params["gamma"] + params["beta"])


if __name__ == "__main__":
    key = jax.random.PRNGKey(0)
    B, Cin, H, W = 2, 4, 16, 16
    C1, C2, out_dim, k = 8, 8, 32, 3
    cfg = make_config(Cin, C1, C2, k, 2, H, W, out_dim)
    flat_dim = C2 * cfg.h2 * cfg.w2                               # 8*5*5 = 200

    ks = jax.random.split(key, 9)
    params = {
        "w1": jax.random.normal(ks[0], (C1, Cin, k, k), jnp.float32)
              / jnp.sqrt(Cin * k * k),
        "b1": 0.1 * jax.random.normal(ks[1], (C1,), jnp.float32),
        "w2": jax.random.normal(ks[2], (C2, C1, k, k), jnp.float32)
              / jnp.sqrt(C1 * k * k),
        "b2": 0.1 * jax.random.normal(ks[3], (C2,), jnp.float32),
        "wp": jax.random.normal(ks[4], (flat_dim, out_dim), jnp.float32)
              / jnp.sqrt(flat_dim),
        "bp": 0.1 * jax.random.normal(ks[5], (out_dim,), jnp.float32),
        "gamma": 1.0 + 0.1 * jax.random.normal(ks[6], (out_dim,), jnp.float32),
        "beta": 0.1 * jax.random.normal(ks[7], (out_dim,), jnp.float32),
    }
    x = jax.random.normal(ks[8], (B, Cin, H, W), jnp.float32)

    ref = jax.block_until_ready(encoder_reference(params, x))

    # --- f32 compute path: tight structural check ---------------------------
    prepped32 = prepare_params(params, cfg, compute_dtype=jnp.float32)
    out32 = jax.block_until_ready(encoder_forward(prepped32, x, cfg=cfg,
                                                  detach=True))
    assert out32.shape == (B, out_dim), out32.shape
    assert out32.dtype == jnp.float32, out32.dtype
    assert jnp.allclose(out32, ref, atol=2e-2, rtol=2e-2), \
        float(jnp.max(jnp.abs(out32 - ref)))

    # --- bf16 operands (MXU-native on v6e/v7x), f32 accum + LN/tanh ----------
    # Loose tolerance only accounts for bf16 operand rounding; the f32 run
    # above is the tight correctness gate.
    prepped16 = prepare_params(params, cfg, compute_dtype=jnp.bfloat16)
    out16 = jax.block_until_ready(encoder_forward(prepped16, x, cfg=cfg,
                                                  detach=False))
    assert out16.shape == (B, out_dim), out16.shape
    assert out16.dtype == jnp.float32, out16.dtype
    assert jnp.allclose(out16, ref, atol=1e-1, rtol=1e-1), \
        float(jnp.max(jnp.abs(out16 - ref)))

    print("KERNEL_OK")
</pallas_src>

<mosaic_0001>
module attributes {stable_mosaic.version = 11 : i64} {
  func.func @_encoder_kernel(%arg0: i32, %arg1: memref<1x36x56xf32, #tpu.memory_space<vmem>>, %arg2: memref<8x36xf32, #tpu.memory_space<vmem>>, %arg3: memref<8x1xf32, #tpu.memory_space<vmem>>, %arg4: memref<9x8x8xf32, #tpu.memory_space<vmem>>, %arg5: memref<8x1xf32, #tpu.memory_space<vmem>>, %arg6: memref<8x35x32xf32, #tpu.memory_space<vmem>>, %arg7: memref<1x32xf32, #tpu.memory_space<vmem>>, %arg8: memref<1x32xf32, #tpu.memory_space<vmem>>, %arg9: memref<1x32xf32, #tpu.memory_space<vmem>>, %arg10: memref<1x1x32xf32, #tpu.memory_space<vmem>>) attributes {dimension_semantics = [#tpu.dimension_semantics<parallel>], iteration_bounds = array<i64: 2>, scalar_prefetch = 0 : i64, scratch_operands = 0 : i64, tpu.core_type = #tpu.core_type<tc>, window_params = [{transform_indices = @transform_0, window_bounds = array<i64: 1, 36, 56>}, {pipeline_mode = #tpu.pipeline_mode<synchronous>, transform_indices = @transform_1, window_bounds = array<i64: 8, 36>}, {pipeline_mode = #tpu.pipeline_mode<synchronous>, transform_indices = @transform_2, window_bounds = array<i64: 8, 1>}, {pipeline_mode = #tpu.pipeline_mode<synchronous>, transform_indices = @transform_3, window_bounds = array<i64: 9, 8, 8>}, {pipeline_mode = #tpu.pipeline_mode<synchronous>, transform_indices = @transform_4, window_bounds = array<i64: 8, 1>}, {pipeline_mode = #tpu.pipeline_mode<synchronous>, transform_indices = @transform_5, window_bounds = array<i64: 8, 35, 32>}, {pipeline_mode = #tpu.pipeline_mode<synchronous>, transform_indices = @transform_6, window_bounds = array<i64: 1, 32>}, {pipeline_mode = #tpu.pipeline_mode<synchronous>, transform_indices = @transform_7, window_bounds = array<i64: 1, 32>}, {pipeline_mode = #tpu.pipeline_mode<synchronous>, transform_indices = @transform_8, window_bounds = array<i64: 1, 32>}, {transform_indices = @transform_9, window_bounds = array<i64: 1, 1, 32>}]} {
    %c0 = arith.constant 0 : index
    %c0_0 = arith.constant 0 : index
    %0 = vector.load %arg2[%c0, %c0_0] : memref<8x36xf32, #tpu.memory_space<vmem>>, vector<8x36xf32>
    %c0_1 = arith.constant 0 : index
    %c0_2 = arith.constant 0 : index
    %c0_3 = arith.constant 0 : index
    %1 = vector.load %arg1[%c0_1, %c0_2, %c0_3] : memref<1x36x56xf32, #tpu.memory_space<vmem>>, vector<1x36x56xf32>
    %2 = vector.shape_cast %1 : vector<1x36x56xf32> to vector<36x56xf32>
    %cst = arith.constant dense<0.000000e+00> : vector<8x56xf32>
    %3 = tpu.matmul %0, %2, %cst {dimension_numbers = #tpu.dot_dimension_numbers<[1], [0], [0], [1], [0, 0, 1, 1], [], []>} : vector<8x36xf32>, vector<36x56xf32>, vector<8x56xf32> -> vector<8x56xf32>
    %c0_4 = arith.constant 0 : index
    %c0_5 = arith.constant 0 : index
    %4 = vector.load %arg3[%c0_4, %c0_5] : memref<8x1xf32, #tpu.memory_space<vmem>>, vector<8x1xf32>
    %5 = vector.broadcast %4 : vector<8x1xf32> to vector<8x56xf32>
    %6 = arith.addf %3, %5 : vector<8x56xf32>
    %cst_6 = arith.constant 0.000000e+00 : f32
    %7 = vector.broadcast %cst_6 : f32 to vector<8x56xf32>
    %8 = arith.maximumf %6, %7 : vector<8x56xf32>
    %cst_7 = arith.constant 0.000000e+00 : f32
    %9 = vector.broadcast %cst_7 : f32 to vector<8x35xf32>
    %c0_8 = arith.constant 0 : index
    %c0_9 = arith.constant 0 : index
    %c0_10 = arith.constant 0 : index
    %10 = vector.load %arg4[%c0_8, %c0_9, %c0_10] : memref<9x8x8xf32, #tpu.memory_space<vmem>>, vector<1x8x8xf32>
    %11 = vector.shape_cast %10 : vector<1x8x8xf32> to vector<8x8xf32>
    %12 = vector.extract_strided_slice %8 {offsets = [0, 0], sizes = [8, 35], strides = [1, 1]} : vector<8x56xf32> to vector<8x35xf32>
    %cst_11 = arith.constant dense<0.000000e+00> : vector<8x35xf32>
    %13 = tpu.matmul %11, %12, %cst_11 {dimension_numbers = #tpu.dot_dimension_numbers<[1], [0], [0], [1], [0, 0, 1, 1], [], []>} : vector<8x8xf32>, vector<8x35xf32>, vector<8x35xf32> -> vector<8x35xf32>
    %14 = arith.addf %9, %13 : vector<8x35xf32>
    %c1 = arith.constant 1 : index
    %c0_12 = arith.constant 0 : index
    %c0_13 = arith.constant 0 : index
    %15 = vector.load %arg4[%c1, %c0_12, %c0_13] : memref<9x8x8xf32, #tpu.memory_space<vmem>>, vector<1x8x8xf32>
    %16 = vector.shape_cast %15 : vector<1x8x8xf32> to vector<8x8xf32>
    %17 = vector.extract_strided_slice %8 {offsets = [0, 1], sizes = [8, 35], strides = [1, 1]} : vector<8x56xf32> to vector<8x35xf32>
    %cst_14 = arith.constant dense<0.000000e+00> : vector<8x35xf32>
    %18 = tpu.matmul %16, %17, %cst_14 {dimension_numbers = #tpu.dot_dimension_numbers<[1], [0], [0], [1], [0, 0, 1, 1], [], []>} : vector<8x8xf32>, vector<8x35xf32>, vector<8x35xf32> -> vector<8x35xf32>
    %19 = arith.addf %14, %18 : vector<8x35xf32>
    %c2 = arith.constant 2 : index
    %c0_15 = arith.constant 0 : index
    %c0_16 = arith.constant 0 : index
    %20 = vector.load %arg4[%c2, %c0_15, %c0_16] : memref<9x8x8xf32, #tpu.memory_space<vmem>>, vector<1x8x8xf32>
    %21 = vector.shape_cast %20 : vector<1x8x8xf32> to vector<8x8xf32>
    %22 = vector.extract_strided_slice %8 {offsets = [0, 2], sizes = [8, 35], strides = [1, 1]} : vector<8x56xf32> to vector<8x35xf32>
    %cst_17 = arith.constant dense<0.000000e+00> : vector<8x35xf32>
    %23 = tpu.matmul %21, %22, %cst_17 {dimension_numbers = #tpu.dot_dimension_numbers<[1], [0], [0], [1], [0, 0, 1, 1], [], []>} : vector<8x8xf32>, vector<8x35xf32>, vector<8x35xf32> -> vector<8x35xf32>
    %24 = arith.addf %19, %23 : vector<8x35xf32>
    %c3 = arith.constant 3 : index
    %c0_18 = arith.constant 0 : index
    %c0_19 = arith.constant 0 : index
    %25 = vector.load %arg4[%c3, %c0_18, %c0_19] : memref<9x8x8xf32, #tpu.memory_space<vmem>>, vector<1x8x8xf32>
    %26 = vector.shape_cast %25 : vector<1x8x8xf32> to vector<8x8xf32>
    %27 = vector.extract_strided_slice %8 {offsets = [0, 7], sizes = [8, 35], strides = [1, 1]} : vector<8x56xf32> to vector<8x35xf32>
    %cst_20 = arith.constant dense<0.000000e+00> : vector<8x35xf32>
    %28 = tpu.matmul %26, %27, %cst_20 {dimension_numbers = #tpu.dot_dimension_numbers<[1], [0], [0], [1], [0, 0, 1, 1], [], []>} : vector<8x8xf32>, vector<8x35xf32>, vector<8x35xf32> -> vector<8x35xf32>
    %29 = arith.addf %24, %28 : vector<8x35xf32>
    %c4 = arith.constant 4 : index
    %c0_21 = arith.constant 0 : index
    %c0_22 = arith.constant 0 : index
    %30 = vector.load %arg4[%c4, %c0_21, %c0_22] : memref<9x8x8xf32, #tpu.memory_space<vmem>>, vector<1x8x8xf32>
    %31 = vector.shape_cast %30 : vector<1x8x8xf32> to vector<8x8xf32>
    %32 = vector.extract_strided_slice %8 {offsets = [0, 8], sizes = [8, 35], strides = [1, 1]} : vector<8x56xf32> to vector<8x35xf32>
    %cst_23 = arith.constant dense<0.000000e+00> : vector<8x35xf32>
    %33 = tpu.matmul %31, %32, %cst_23 {dimension_numbers = #tpu.dot_dimension_numbers<[1], [0], [0], [1], [0, 0, 1, 1], [], []>} : vector<8x8xf32>, vector<8x35xf32>, vector<8x35xf32> -> vector<8x35xf32>
    %34 = arith.addf %29, %33 : vector<8x35xf32>
    %c5 = arith.constant 5 : index
    %c0_24 = arith.constant 0 : index
    %c0_25 = arith.constant 0 : index
    %35 = vector.load %arg4[%c5, %c0_24, %c0_25] : memref<9x8x8xf32, #tpu.memory_space<vmem>>, vector<1x8x8xf32>
    %36 = vector.shape_cast %35 : vector<1x8x8xf32> to vector<8x8xf32>
    %37 = vector.extract_strided_slice %8 {offsets = [0, 9], sizes = [8, 35], strides = [1, 1]} : vector<8x56xf32> to vector<8x35xf32>
    %cst_26 = arith.constant dense<0.000000e+00> : vector<8x35xf32>
    %38 = tpu.matmul %36, %37, %cst_26 {dimension_numbers = #tpu.dot_dimension_numbers<[1], [0], [0], [1], [0, 0, 1, 1], [], []>} : vector<8x8xf32>, vector<8x35xf32>, vector<8x35xf32> -> vector<8x35xf32>
    %39 = arith.addf %34, %38 : vector<8x35xf32>
    %c6 = arith.constant 6 : index
    %c0_27 = arith.constant 0 : index
    %c0_28 = arith.constant 0 : index
    %40 = vector.load %arg4[%c6, %c0_27, %c0_28] : memref<9x8x8xf32, #tpu.memory_space<vmem>>, vector<1x8x8xf32>
    %41 = vector.shape_cast %40 : vector<1x8x8xf32> to vector<8x8xf32>
    %42 = vector.extract_strided_slice %8 {offsets = [0, 14], sizes = [8, 35], strides = [1, 1]} : vector<8x56xf32> to vector<8x35xf32>
    %cst_29 = arith.constant dense<0.000000e+00> : vector<8x35xf32>
    %43 = tpu.matmul %41, %42, %cst_29 {dimension_numbers = #tpu.dot_dimension_numbers<[1], [0], [0], [1], [0, 0, 1, 1], [], []>} : vector<8x8xf32>, vector<8x35xf32>, vector<8x35xf32> -> vector<8x35xf32>
    %44 = arith.addf %39, %43 : vector<8x35xf32>
    %c7 = arith.constant 7 : index
    %c0_30 = arith.constant 0 : index
    %c0_31 = arith.constant 0 : index
    %45 = vector.load %arg4[%c7, %c0_30, %c0_31] : memref<9x8x8xf32, #tpu.memory_space<vmem>>, vector<1x8x8xf32>
    %46 = vector.shape_cast %45 : vector<1x8x8xf32> to vector<8x8xf32>
    %47 = vector.extract_strided_slice %8 {offsets = [0, 15], sizes = [8, 35], strides = [1, 1]} : vector<8x56xf32> to vector<8x35xf32>
    %cst_32 = arith.constant dense<0.000000e+00> : vector<8x35xf32>
    %48 = tpu.matmul %46, %47, %cst_32 {dimension_numbers = #tpu.dot_dimension_numbers<[1], [0], [0], [1], [0, 0, 1, 1], [], []>} : vector<8x8xf32>, vector<8x35xf32>, vector<8x35xf32> -> vector<8x35xf32>
    %49 = arith.addf %44, %48 : vector<8x35xf32>
    %c8 = arith.constant 8 : index
    %c0_33 = arith.constant 0 : index
    %c0_34 = arith.constant 0 : index
    %50 = vector.load %arg4[%c8, %c0_33, %c0_34] : memref<9x8x8xf32, #tpu.memory_space<vmem>>, vector<1x8x8xf32>
    %51 = vector.shape_cast %50 : vector<1x8x8xf32> to vector<8x8xf32>
    %52 = vector.extract_strided_slice %8 {offsets = [0, 16], sizes = [8, 35], strides = [1, 1]} : vector<8x56xf32> to vector<8x35xf32>
    %cst_35 = arith.constant dense<0.000000e+00> : vector<8x35xf32>
    %53 = tpu.matmul %51, %52, %cst_35 {dimension_numbers = #tpu.dot_dimension_numbers<[1], [0], [0], [1], [0, 0, 1, 1], [], []>} : vector<8x8xf32>, vector<8x35xf32>, vector<8x35xf32> -> vector<8x35xf32>
    %54 = arith.addf %49, %53 : vector<8x35xf32>
    %c0_36 = arith.constant 0 : index
    %c0_37 = arith.constant 0 : index
    %55 = vector.load %arg5[%c0_36, %c0_37] : memref<8x1xf32, #tpu.memory_space<vmem>>, vector<8x1xf32>
    %56 = vector.broadcast %55 : vector<8x1xf32> to vector<8x35xf32>
    %57 = arith.addf %54, %56 : vector<8x35xf32>
    %cst_38 = arith.constant 0.000000e+00 : f32
    %58 = vector.broadcast %cst_38 : f32 to vector<8x35xf32>
    %59 = arith.maximumf %57, %58 : vector<8x35xf32>
    %c0_39 = arith.constant 0 : index
    %c0_40 = arith.constant 0 : index
    %60 = vector.load %arg7[%c0_39, %c0_40] : memref<1x32xf32, #tpu.memory_space<vmem>>, vector<1x32xf32>
    %61 = vector.extract_strided_slice %59 {offsets = [0, 0], sizes = [1, 35], strides = [1, 1]} : vector<8x35xf32> to vector<1x35xf32>
    %c0_41 = arith.constant 0 : index
    %c0_42 = arith.constant 0 : index
    %c0_43 = arith.constant 0 : index
    %62 = vector.load %arg6[%c0_41, %c0_42, %c0_43] : memref<8x35x32xf32, #tpu.memory_space<vmem>>, vector<1x35x32xf32>
    %63 = vector.shape_cast %62 : vector<1x35x32xf32> to vector<35x32xf32>
    %cst_44 = arith.constant dense<0.000000e+00> : vector<1x32xf32>
    %64 = tpu.matmul %61, %63, %cst_44 {dimension_numbers = #tpu.dot_dimension_numbers<[1], [0], [0], [1], [0, 0, 1, 1], [], []>} : vector<1x35xf32>, vector<35x32xf32>, vector<1x32xf32> -> vector<1x32xf32>
    %65 = arith.addf %60, %64 : vector<1x32xf32>
    %66 = vector.extract_strided_slice %59 {offsets = [1, 0], sizes = [1, 35], strides = [1, 1]} : vector<8x35xf32> to vector<1x35xf32>
    %c1_45 = arith.constant 1 : index
    %c0_46 = arith.constant 0 : index
    %c0_47 = arith.constant 0 : index
    %67 = vector.load %arg6[%c1_45, %c0_46, %c0_47] : memref<8x35x32xf32, #tpu.memory_space<vmem>>, vector<1x35x32xf32>
    %68 = vector.shape_cast %67 : vector<1x35x32xf32> to vector<35x32xf32>
    %cst_48 = arith.constant dense<0.000000e+00> : vector<1x32xf32>
    %69 = tpu.matmul %66, %68, %cst_48 {dimension_numbers = #tpu.dot_dimension_numbers<[1], [0], [0], [1], [0, 0, 1, 1], [], []>} : vector<1x35xf32>, vector<35x32xf32>, vector<1x32xf32> -> vector<1x32xf32>
    %70 = arith.addf %65, %69 : vector<1x32xf32>
    %71 = vector.extract_strided_slice %59 {offsets = [2, 0], sizes = [1, 35], strides = [1, 1]} : vector<8x35xf32> to vector<1x35xf32>
    %c2_49 = arith.constant 2 : index
    %c0_50 = arith.constant 0 : index
    %c0_51 = arith.constant 0 : index
    %72 = vector.load %arg6[%c2_49, %c0_50, %c0_51] : memref<8x35x32xf32, #tpu.memory_space<vmem>>, vector<1x35x32xf32>
    %73 = vector.shape_cast %72 : vector<1x35x32xf32> to vector<35x32xf32>
    %cst_52 = arith.constant dense<0.000000e+00> : vector<1x32xf32>
    %74 = tpu.matmul %71, %73, %cst_52 {dimension_numbers = #tpu.dot_dimension_numbers<[1], [0], [0], [1], [0, 0, 1, 1], [], []>} : vector<1x35xf32>, vector<35x32xf32>, vector<1x32xf32> -> vector<1x32xf32>
    %75 = arith.addf %70, %74 : vector<1x32xf32>
    %76 = vector.extract_strided_slice %59 {offsets = [3, 0], sizes = [1, 35], strides = [1, 1]} : vector<8x35xf32> to vector<1x35xf32>
    %c3_53 = arith.constant 3 : index
    %c0_54 = arith.constant 0 : index
    %c0_55 = arith.constant 0 : index
    %77 = vector.load %arg6[%c3_53, %c0_54, %c0_55] : memref<8x35x32xf32, #tpu.memory_space<vmem>>, vector<1x35x32xf32>
    %78 = vector.shape_cast %77 : vector<1x35x32xf32> to vector<35x32xf32>
    %cst_56 = arith.constant dense<0.000000e+00> : vector<1x32xf32>
    %79 = tpu.matmul %76, %78, %cst_56 {dimension_numbers = #tpu.dot_dimension_numbers<[1], [0], [0], [1], [0, 0, 1, 1], [], []>} : vector<1x35xf32>, vector<35x32xf32>, vector<1x32xf32> -> vector<1x32xf32>
    %80 = arith.addf %75, %79 : vector<1x32xf32>
    %81 = vector.extract_strided_slice %59 {offsets = [4, 0], sizes = [1, 35], strides = [1, 1]} : vector<8x35xf32> to vector<1x35xf32>
    %c4_57 = arith.constant 4 : index
    %c0_58 = arith.constant 0 : index
    %c0_59 = arith.constant 0 : index
    %82 = vector.load %arg6[%c4_57, %c0_58, %c0_59] : memref<8x35x32xf32, #tpu.memory_space<vmem>>, vector<1x35x32xf32>
    %83 = vector.shape_cast %82 : vector<1x35x32xf32> to vector<35x32xf32>
    %cst_60 = arith.constant dense<0.000000e+00> : vector<1x32xf32>
    %84 = tpu.matmul %81, %83, %cst_60 {dimension_numbers = #tpu.dot_dimension_numbers<[1], [0], [0], [1], [0, 0, 1, 1], [], []>} : vector<1x35xf32>, vector<35x32xf32>, vector<1x32xf32> -> vector<1x32xf32>
    %85 = arith.addf %80, %84 : vector<1x32xf32>
    %86 = vector.extract_strided_slice %59 {offsets = [5, 0], sizes = [1, 35], strides = [1, 1]} : vector<8x35xf32> to vector<1x35xf32>
    %c5_61 = arith.constant 5 : index
    %c0_62 = arith.constant 0 : index
    %c0_63 = arith.constant 0 : index
    %87 = vector.load %arg6[%c5_61, %c0_62, %c0_63] : memref<8x35x32xf32, #tpu.memory_space<vmem>>, vector<1x35x32xf32>
    %88 = vector.shape_cast %87 : vector<1x35x32xf32> to vector<35x32xf32>
    %cst_64 = arith.constant dense<0.000000e+00> : vector<1x32xf32>
    %89 = tpu.matmul %86, %88, %cst_64 {dimension_numbers = #tpu.dot_dimension_numbers<[1], [0], [0], [1], [0, 0, 1, 1], [], []>} : vector<1x35xf32>, vector<35x32xf32>, vector<1x32xf32> -> vector<1x32xf32>
    %90 = arith.addf %85, %89 : vector<1x32xf32>
    %91 = vector.extract_strided_slice %59 {offsets = [6, 0], sizes = [1, 35], strides = [1, 1]} : vector<8x35xf32> to vector<1x35xf32>
    %c6_65 = arith.constant 6 : index
    %c0_66 = arith.constant 0 : index
    %c0_67 = arith.constant 0 : index
    %92 = vector.load %arg6[%c6_65, %c0_66, %c0_67] : memref<8x35x32xf32, #tpu.memory_space<vmem>>, vector<1x35x32xf32>
    %93 = vector.shape_cast %92 : vector<1x35x32xf32> to vector<35x32xf32>
    %cst_68 = arith.constant dense<0.000000e+00> : vector<1x32xf32>
    %94 = tpu.matmul %91, %93, %cst_68 {dimension_numbers = #tpu.dot_dimension_numbers<[1], [0], [0], [1], [0, 0, 1, 1], [], []>} : vector<1x35xf32>, vector<35x32xf32>, vector<1x32xf32> -> vector<1x32xf32>
    %95 = arith.addf %90, %94 : vector<1x32xf32>
    %96 = vector.extract_strided_slice %59 {offsets = [7, 0], sizes = [1, 35], strides = [1, 1]} : vector<8x35xf32> to vector<1x35xf32>
    %c7_69 = arith.constant 7 : index
    %c0_70 = arith.constant 0 : index
    %c0_71 = arith.constant 0 : index
    %97 = vector.load %arg6[%c7_69, %c0_70, %c0_71] : memref<8x35x32xf32, #tpu.memory_space<vmem>>, vector<1x35x32xf32>
    %98 = vector.shape_cast %97 : vector<1x35x32xf32> to vector<35x32xf32>
    %cst_72 = arith.constant dense<0.000000e+00> : vector<1x32xf32>
    %99 = tpu.matmul %96, %98, %cst_72 {dimension_numbers = #tpu.dot_dimension_numbers<[1], [0], [0], [1], [0, 0, 1, 1], [], []>} : vector<1x35xf32>, vector<35x32xf32>, vector<1x32xf32> -> vector<1x32xf32>
    %100 = arith.addf %95, %99 : vector<1x32xf32>
    %cst_73 = arith.constant dense<0.000000e+00> : vector<1xf32>
    %101 = vector.multi_reduction <add>, %100, %cst_73 [1] : vector<1x32xf32> to vector<1xf32>
    %102 = vector.shape_cast %101 : vector<1xf32> to vector<1x1xf32>
    %cst_74 = arith.constant 3.200000e+01 : f32
    %103 = vector.broadcast %cst_74 : f32 to vector<1x1xf32>
    %104 = arith.divf %102, %103 : vector<1x1xf32>
    %105 = vector.broadcast %104 : vector<1x1xf32> to vector<1x32xf32>
    %106 = arith.subf %100, %105 : vector<1x32xf32>
    %107 = arith.mulf %106, %106 : vector<1x32xf32>
    %cst_75 = arith.constant dense<0.000000e+00> : vector<1xf32>
    %108 = vector.multi_reduction <add>, %107, %cst_75 [1] : vector<1x32xf32> to vector<1xf32>
    %109 = vector.shape_cast %108 : vector<1xf32> to vector<1x1xf32>
    %cst_76 = arith.constant 3.200000e+01 : f32
    %110 = vector.broadcast %cst_76 : f32 to vector<1x1xf32>
    %111 = arith.divf %109, %110 : vector<1x1xf32>
    %112 = vector.broadcast %104 : vector<1x1xf32> to vector<1x32xf32>
    %113 = arith.subf %100, %112 : vector<1x32xf32>
    %cst_77 = arith.constant 9.99999974E-6 : f32
    %114 = vector.broadcast %cst_77 : f32 to vector<1x1xf32>
    %115 = arith.addf %111, %114 : vector<1x1xf32>
    %116 = math.rsqrt %115 : vector<1x1xf32>
    %117 = vector.broadcast %116 : vector<1x1xf32> to vector<1x32xf32>
    %118 = arith.mulf %113, %117 : vector<1x32xf32>
    %c0_78 = arith.constant 0 : index
    %c0_79 = arith.constant 0 : index
    %119 = vector.load %arg8[%c0_78, %c0_79] : memref<1x32xf32, #tpu.memory_space<vmem>>, vector<1x32xf32>
    %120 = arith.mulf %118, %119 : vector<1x32xf32>
    %c0_80 = arith.constant 0 : index
    %c0_81 = arith.constant 0 : index
    %121 = vector.load %arg9[%c0_80, %c0_81] : memref<1x32xf32, #tpu.memory_space<vmem>>, vector<1x32xf32>
    %122 = arith.addf %120, %121 : vector<1x32xf32>
    %123 = math.tanh %122 : vector<1x32xf32>
    %c0_82 = arith.constant 0 : index
    %c0_83 = arith.constant 0 : index
    %c0_84 = arith.constant 0 : index
    %124 = vector.load %arg10[%c0_82, %c0_83, %c0_84] : memref<1x1x32xf32, #tpu.memory_space<vmem>>, vector<1x1x32xf32>
    %125 = vector.shape_cast %124 : vector<1x1x32xf32> to vector<1x32xf32>
    %126 = vector.shape_cast %123 : vector<1x32xf32> to vector<1x1x32xf32>
    tpu.vector_store %arg10[%c0_82, %c0_83, %c0_84], %126 {strides = array<i32>} : memref<1x1x32xf32, #tpu.memory_space<vmem>>, vector<1x1x32xf32>,
    return
  }
  func.func @transform_0(%arg0: i32) -> (i32, i32, i32) {
    %c0_i32 = arith.constant 0 : i32
    %c0_i32_0 = arith.constant 0 : i32
    %c0_i32_1 = arith.constant 0 : i32
    return %arg0, %c0_i32, %c0_i32_0 : i32, i32, i32
  }
  func.func @transform_1(%arg0: i32) -> (i32, i32) {
    %c0_i32 = arith.constant 0 : i32
    %c0_i32_0 = arith.constant 0 : i32
    %c0_i32_1 = arith.constant 0 : i32
    return %c0_i32, %c0_i32_0 : i32, i32
  }
  func.func @transform_2(%arg0: i32) -> (i32, i32) {
    %c0_i32 = arith.constant 0 : i32
    %c0_i32_0 = arith.constant 0 : i32
    %c0_i32_1 = arith.constant 0 : i32
    return %c0_i32, %c0_i32_0 : i32, i32
  }
  func.func @transform_3(%arg0: i32) -> (i32, i32, i32) {
    %c0_i32 = arith.constant 0 : i32
    %c0_i32_0 = arith.constant 0 : i32
    %c0_i32_1 = arith.constant 0 : i32
    %c0_i32_2 = arith.constant 0 : i32
    return %c0_i32, %c0_i32_0, %c0_i32_1 : i32, i32, i32
  }
  func.func @transform_4(%arg0: i32) -> (i32, i32) {
    %c0_i32 = arith.constant 0 : i32
    %c0_i32_0 = arith.constant 0 : i32
    %c0_i32_1 = arith.constant 0 : i32
    return %c0_i32, %c0_i32_0 : i32, i32
  }
  func.func @transform_5(%arg0: i32) -> (i32, i32, i32) {
    %c0_i32 = arith.constant 0 : i32
    %c0_i32_0 = arith.constant 0 : i32
    %c0_i32_1 = arith.constant 0 : i32
    %c0_i32_2 = arith.constant 0 : i32
    return %c0_i32, %c0_i32_0, %c0_i32_1 : i32, i32, i32
  }
  func.func @transform_6(%arg0: i32) -> (i32, i32) {
    %c0_i32 = arith.constant 0 : i32
    %c0_i32_0 = arith.constant 0 : i32
    %c0_i32_1 = arith.constant 0 : i32
    return %c0_i32, %c0_i32_0 : i32, i32
  }
  func.func @transform_7(%arg0: i32) -> (i32, i32) {
    %c0_i32 = arith.constant 0 : i32
    %c0_i32_0 = arith.constant 0 : i32
    %c0_i32_1 = arith.constant 0 : i32
    return %c0_i32, %c0_i32_0 : i32, i32
  }
  func.func @transform_8(%arg0: i32) -> (i32, i32) {
    %c0_i32 = arith.constant 0 : i32
    %c0_i32_0 = arith.constant 0 : i32
    %c0_i32_1 = arith.constant 0 : i32
    return %c0_i32, %c0_i32_0 : i32, i32
  }
  func.func @transform_9(%arg0: i32) -> (i32, i32, i32) {
    %c0_i32 = arith.constant 0 : i32
    %c0_i32_0 = arith.constant 0 : i32
    %c0_i32_1 = arith.constant 0 : i32
    return %arg0, %c0_i32, %c0_i32_0 : i32, i32, i32
  }
}

</mosaic_0001>

<bundles_post_ra>
// kernel: encoder_forward.1
= control target key start
LH: loop header
LB: loop body
LE: loop exit
PB: predicated region body
PF: predicated region fallthrough
CT: control target
= control target key end

     0   :  { %14 = vsyncpa [#allocation3], 0  ;;  %s2770_s0 = inlined_call_operand.vmem [shape: f32[2,36,56], index: 0, kind: input, shape index: {}]   ;;  %s2771_s1 = inlined_call_operand.vmem [shape: f32[8,36], index: 1, kind: input, shape index: {}]   ;;  %s2772_s2 = inlined_call_operand.vmem [shape: f32[8,1], index: 2, kind: input, shape index: {}]   ;;  %s2773_s3 = inlined_call_operand.vmem [shape: f32[9,8,8], index: 3, kind: input, shape index: {}]   ;;  %s2774_s4 = inlined_call_operand.vmem [shape: f32[8,1], index: 4, kind: input, shape index: {}]   ;;  %s2775_s5 = inlined_call_operand.vmem [shape: f32[8,35,32], index: 5, kind: input, shape index: {}]   ;;  %s2776_s6 = inlined_call_operand.vmem [shape: f32[1,32], index: 6, kind: input, shape index: {}]   ;;  %s2777_s7 = inlined_call_operand.vmem [shape: f32[1,32], index: 7, kind: input, shape index: {}]   ;;  %s2778_s8 = inlined_call_operand.vmem [shape: f32[1,32], index: 8, kind: input, shape index: {}]   ;;  %s2779_s9 = inlined_call_operand.hbm [shape: f32[2,1,32], index: 9, kind: output, shape index: {}]  }
   0x1   :  { %16 = vsyncpa [#allocation3 + $0x1], 0  ;;  %s2384_s30 = smov 0   ;;  %s2386_s10 = smov 0  }
   0x2   :  { %s2388_s11 = smov 0   ;;  %s2390_s12 = smov 0  }
   0x3 LB: > { %s2405_s13 = sadd.s32 4294967295, %s2320_s12   ;;  %s1891_s14 = sadd.s32 4294967294, %s2320_s12   ;;  %s2320_s12 = sphi %s2390_s12, %s2785_s12   ;;  %s2316_s11 = sphi %s2388_s11, %s2784_s11   ;;  %s2312_s10 = sphi %s2386_s10, %s2783_s10   ;;  %s2308_s30 = sphi %s2384_s30, %s2782_s30  }
   0x4   : > { %s2409_s15 = sadd.s32 1, %s2320_s12   ;;  %s223_s16 = sadd.s32 1, %s2316_s11 }
   0x5   : > { %s220_s17 = ssub.s32 %s2320_s12, %s2409_s15  ;;  %p233_p0 = scmp.ne.s32.totalorder %s2316_s11, %s2312_s10 }
   0x6   : > { %p221_p1 = scmp.eq.s32.totalorder %s220_s17, 0  ;;  %p234_p2 = scmp.eq.s32.totalorder %s2405_s13, 1 }
   0x7   : > { %p239_p3 = scmp.ne.s32.totalorder %s2312_s10, %s2308_s30  ;;  %p240_p4 = scmp.eq.s32.totalorder %s1891_s14, 1 }
   0x8   : > { %s2420_s18 = scalar_select %p221_p1, %s2316_s11, %s223_s16  }
   0x9   : > { %p2422_p5 = por %p234_p2, %p233_p0  ;;  %p2426_p6 = por %p240_p4, %p239_p3 }
   0xa   : > { %p1894_p7 = scmp.ge.s32.totalorder %s2320_s12, 1  ;;  %p290_p8 = scmp.lt.s32.totalorder %s2320_s12, 3 }
   0xc   : > { %p291_p9 = pnand %p1894_p7, %p290_p8 }
   0xd   : > { %p325_p10 = scmp.lt.s32.totalorder (!%p291_p9), %s2405_s13, 1  ;;  %s2325_s14 = smov (!%p291_p9), 126  }
   0xe   : > { %294 = sbr.rel (%p291_p9) target bundleno = 1132 (0x46c), region = 56  ;;  %s2326_s16 = smov (!%p291_p9), 127  }
   0xf   : > { %s2327_s17 = smov (!%p291_p9), 121   ;;  %s2328_s21 = smov (!%p291_p9), 120  }
  0x10   : > { %s2329_s22 = smov (!%p291_p9), 119   ;;  %s2332_s25 = smov (!%p291_p9), 112  }
  0x13   : > { %v2322_v0 = vmov 0.0   ;;  %vm2323_vm0 = vmmov 0   ;;  %v336_v1 = vld [vmem:[%s2772_s2] sm:$0xff]  ;;  %s326_s23 = scalar_select %p325_p10, %s2405_s13, 1  ;;  %v2324_v2 = vmov 0   ;;  %vm346_vm1 = vcmask 1043456  }
  0x14   : > { %2041 = vmatprep.subr.mxu0 %v2322_v0  ;;  %2051 = vmatprep.mubr.msk.f32.mxu0 %vm2323_vm0, %v2322_v0  ;;  %v330_v8 = vld [vmem:[%s2771_s1] sm:$0xff]  ;;  %vm342_vm2 = vcmask 293888   ;;  %v1898_v15 = vld [vmem:[%s2773_s3 + $0x8] sm:$0xff]  ;;  %vm428_vm3 = vcmask 64512   ;;  %v1903_v20 = vld [vmem:[%s2773_s3 + $0x18] sm:$0xff]  ;;  %vm1146_vm4 = vcmask 1042432  }
  0x15   : > { %2254 = vset.pattern.permute.xlu0 %v2324_v2  ;;  %2054 = vmatprep.subr.mxu1 %v2322_v0  ;;  %s2203_s24 = smul.u32 40, %s326_s23  ;;  %s2330_s23 = smov 114   ;;  %v1128_v14 = vld [vmem:[%s2774_s4] sm:$0xff]  ;;  %v1901_v22 = vld [vmem:[%s2773_s3 + $0x10] sm:$0xff]  ;;  %v1907_v24 = vld [vmem:[%s2773_s3 + $0x28] sm:$0xff]  ;;  %vm1142_vm5 = vcmask 285696  }
  0x16   : > { %339 = vperm.xlu0 %2254, %v336_v1   ;;  %2056 = vmatprep.mubr.msk.f32.mxu1 %vm2323_vm0, %v2322_v0  ;;  %v421_v18 = vld [vmem:[%s2773_s3] sm:$0xff]  ;;  %v1911_v28 = vld [vmem:[%s2773_s3 + $0x38] sm:$0xff]  ;;  %v1909_v29 = vld [vmem:[%s2773_s3 + $0x30] sm:$0xff]  ;;  %vm1802_vm6 = vcmask 253952  }
  0x17   : > { %2255 = vset.pattern.permute.xlu1 %v2324_v2  ;;  %s329_s27 = scalar_lea.vmem %s2770_s0, %s2203_s24  ;;  %s2331_s24 = smov 113   ;;  %v1905_v25 = vld [vmem:[%s2773_s3 + $0x20] sm:$0xff]  ;;  %v1140_v33 = vld [vmem:[%s2775_s5 + $0x18] sm:$0xff]  ;;  %v1921_v34 = vld [vmem:[%s2775_s5 + $0x48] sm:$0x7] }
  0x18   : > { %v335_v3 = vld [vmem:[%s329_s27 + $0x20] sm:$0xf]  ;;  %v334_v4 = vld [vmem:[%s329_s27 + $0x18] sm:$0xff]  ;;  %v333_v5 = vld [vmem:[%s329_s27 + $0x10] sm:$0xff] }
  0x19   : > { %2042 = vmatpush3.msk.msra.mxu0 %vm346_vm1, %v335_v3  ;;  %v332_v6 = vld [vmem:[%s329_s27 + $0x8] sm:$0xff]  ;;  %v331_v7 = vld [vmem:[%s329_s27] sm:$0xff]  ;;  %v1139_v35 = vld [vmem:[%s2775_s5 + $0x10] sm:$0xff] }
  0x1a   : > { %2043 = vmatprep.subr.mxu0 %v2322_v0  ;;  %v1913_v31 = vld [vmem:[%s2773_s3 + $0x40] sm:$0xff]  ;;  %v1138_v37 = vld [vmem:[%s2775_s5 + $0x8] sm:$0xff]  ;;  %v1919_v38 = vld [vmem:[%s2775_s5 + $0x38] sm:$0xff] }
  0x1b   : > { %2044 = vmatpush3.msra.mxu0 %v334_v4  ;;  %v1141_v32 = vld [vmem:[%s2775_s5 + $0x20] sm:$0x7]  ;;  %v1918_v40 = vld [vmem:[%s2775_s5 + $0x30] sm:$0xff]  ;;  %v1917_v41 = vld [vmem:[%s2775_s5 + $0x28] sm:$0xff] }
  0x1c   : > { %2045 = vmatprep.subr.mxu0 %v2322_v0  ;;  %v1920_v36 = vld [vmem:[%s2775_s5 + $0x40] sm:$0xff] }
  0x1d   : > { %2046 = vmatpush3.msra.mxu0 %v333_v5  ;;  %v1137_v39 = vld [vmem:[%s2775_s5] sm:$0xff] }
  0x1e   : > { %2047 = vmatprep.subr.mxu0 %v2322_v0 }
  0x1f   : > { %2048 = vmatpush3.msra.mxu0 %v332_v6 }
  0x20   : > { %2049 = vmatprep.subr.mxu0 %v2322_v0 }
  0x21   : > { %2050 = vmatpush3.msra.mxu0 %v331_v7 }
  0x22   : > { %2052 = vmatmul.mubr.msk.f32.vlgmr.msra.gmra.mxu0 %vm342_vm2, %v330_v8  ;;  %2069 = vmatprep.subr.mxu0 %v2322_v0  ;;  %v1928_v8 = vld [vmem:[%s2775_s5 + $0x70] sm:$0x7] }
  0x23   : > { %2071 = vmatprep.mubr.msk.f32.mxu0 %vm2323_vm0, %v2322_v0 }
  0x91   : > { %v340_v9 = vpop.permute.xlu0 %339 }
  0xe2   : > { %v416_v10 = vpop.f32.mrf.mxu0 }
  0xe3   : > { %v417_v11 = vadd.f32 %v416_v10, %v340_v9  ;;  %v1927_v10 = vld [vmem:[%s2775_s5 + $0x68] sm:$0xff] }
  0xe4   : > { %v2053_v12 = vpop.f32.mrf.mxu0 }
  0xe5   : > { %v420_v13 = vmax.f32 %v417_v11, 0.0  ;;  %v1935_v11 = vld [vmem:[%s2775_s5 + $0x98] sm:$0x7]  ;;  %v1926_v12 = vld [vmem:[%s2775_s5 + $0x60] sm:$0xff] }
  0xe7   : > { %577 = vrot.lane.b32.xlu1 %v420_v13, %s2325_s14  ;;  %425 = vrot.lane.b32.xlu0 %v420_v13, %s2326_s16 }
  0xeb   : > { %656 = vrot.lane.b32.xlu1 %v420_v13, %s2327_s17  ;;  %735 = vrot.lane.b32.xlu0 %v420_v13, %s2328_s21  ;;  %s2333_s21 = smov [#allocation2]  }
  0xef   : > { %814 = vrot.lane.b32.xlu1 %v420_v13, %s2329_s22  ;;  %893 = vrot.lane.b32.xlu0 %v420_v13, %s2330_s23  ;;  %s2264_s22 = sshll.u32 %s2333_s21, 4  ;;  %s2265_s22 = int_to_ptr.vmem [resolvable:$false] %s2264_s22 }
  0xf3   : > { %972 = vrot.lane.b32.xlu1 %v420_v13, %s2331_s24  ;;  %1051 = vrot.lane.b32.xlu0 %v420_v13, %s2332_s25  ;;  %s323_s24 = sand.u32 1, %s2312_s10   ;;  %s1966_s25 = sshll.u32 %s2405_s13, 4 }
  0xf4   : > { %s324_s26 = scalar_lea.vmem [#allocation2], %s323_s24  ;;  %s2734_s14 = scalar_lea.hbm %s2779_s9, %s1966_s25 }
  0xf5   : > { %s1836_s27 = sshll.u32 %s324_s26, 4  ;;  %s1824_s16 = scalar_lea.sflag [#allocation3], %s323_s24  ;;  %s1837_s27 = int_to_ptr.vmem [resolvable:$true] %s1836_s27 }
  0xf6   : > { %s2260_s17 = scalar_lea.vmem %s1837_s27, 16  ;;  %s2266_s13 = scalar_lea.vmem %s2265_s22, 32 }
  0xf7   : > { %1131 = vperm.xlu1 %2255, %v1128_v14   ;;  %v1925_v14 = vld [vmem:[%s2775_s5 + $0x58] sm:$0xff]  ;;  %p2261_p11 = scmp.ne.s32.totalorder %s1837_s27, %s2260_s17  ;;  %p2267_p0 = scmp.lt.s32.totalorder %s1837_s27, %s2265_s22 }
  0xf8   : > { %p2268_p1 = scmp.lt.s32.totalorder %s2266_s13, %s2260_s17 }
  0xf9   : > { %p2262_p12 = pnand %p2261_p11, %p2422_p5 }
  0xfa   : > { %p2269_p2 = por %p2268_p1, %p2267_p0 }
  0xfb   : > { %p2263_p13 = pneg %p2262_p12 }
  0xfd   : > { %p2270_p3 = pnand %p2269_p2, %p2263_p13 }
 0x159   : > { %v578_v16 = vpop.permute.xlu1 %577  ;;  %v426_v17 = vpop.permute.xlu0 %425 }
 0x15a   : > { %2055 = vmatpush3.msra.mxu1 %v426_v17  ;;  %v1932_v17 = vld [vmem:[%s2775_s5 + $0x80] sm:$0xff] }
 0x15b   : > { %2057 = vmatmul.mubr.msk.f32.vlgmr.msra.gmra.mxu1 %vm428_vm3, %v1898_v15  ;;  %2059 = vmatprep.subr.mxu1 %v2322_v0  ;;  %v1933_v15 = vld [vmem:[%s2775_s5 + $0x88] sm:$0xff] }
 0x15c   : > { %2060 = vmatpush3.msra.mxu1 %v420_v13  ;;  %2061 = vmatprep.mubr.msk.f32.mxu1 %vm2323_vm0, %v2322_v0  ;;  %v1934_v13 = vld [vmem:[%s2775_s5 + $0x90] sm:$0xff] }
 0x15d   : > { %v657_v19 = vpop.permute.xlu1 %656  ;;  %2064 = vmatprep.subr.mxu1 %v2322_v0  ;;  %v736_v21 = vpop.permute.xlu0 %735 }
 0x15e   : > { %2070 = vmatpush3.msra.mxu0 %v657_v19  ;;  %v1931_v19 = vld [vmem:[%s2775_s5 + $0x78] sm:$0xff] }
 0x15f   : > { %2062 = vmatmul.mubr.msk.f32.vlgmr.msra.gmra.mxu1 %vm428_vm3, %v421_v18  ;;  %2079 = vmatprep.subr.mxu0 %v2322_v0 }
 0x160   : > { %2065 = vmatpush3.msra.mxu1 %v578_v16  ;;  %2066 = vmatprep.mubr.msk.f32.mxu1 %vm2323_vm0, %v2322_v0  ;;  %v1924_v16 = vld [vmem:[%s2775_s5 + $0x50] sm:$0xff] }
 0x161   : > { %v815_v23 = vpop.permute.xlu1 %814  ;;  %2072 = vmatmul.mubr.msk.f32.vlgmr.msra.gmra.mxu0 %vm428_vm3, %v1903_v20  ;;  %2074 = vmatprep.subr.mxu1 %v2322_v0  ;;  %v894_v26 = vpop.permute.xlu0 %893  ;;  %v1942_v20 = vld [vmem:[%s2775_s5 + $0xc0] sm:$0x7] }
 0x162   : > { %2080 = vmatpush3.msra.mxu0 %v815_v23  ;;  %2081 = vmatprep.mubr.msk.f32.mxu0 %vm2323_vm0, %v2322_v0  ;;  %v1949_v23 = vld [vmem:[%s2775_s5 + $0xe8] sm:$0x7] }
 0x163   : > { %2067 = vmatmul.mubr.msk.f32.vlgmr.msra.gmra.mxu1 %vm428_vm3, %v1901_v22  ;;  %2089 = vmatprep.subr.mxu0 %v2322_v0  ;;  %v1941_v22 = vld [vmem:[%s2775_s5 + $0xb8] sm:$0xff] }
 0x164   : > { %2075 = vmatpush3.msra.mxu1 %v736_v21  ;;  %2076 = vmatprep.mubr.msk.f32.mxu1 %vm2323_vm0, %v2322_v0 }
 0x165   : > { %v973_v27 = vpop.permute.xlu1 %972  ;;  %2082 = vmatmul.mubr.msk.f32.vlgmr.msra.gmra.mxu0 %vm428_vm3, %v1907_v24  ;;  %2084 = vmatprep.subr.mxu1 %v2322_v0  ;;  %v1052_v30 = vpop.permute.xlu0 %1051  ;;  %v1940_v24 = vld [vmem:[%s2775_s5 + $0xb0] sm:$0xff] }
 0x166   : > { %2090 = vmatpush3.msra.mxu0 %v973_v27  ;;  %2091 = vmatprep.mubr.msk.f32.mxu0 %vm2323_vm0, %v2322_v0  ;;  %v1947_v27 = vld [vmem:[%s2775_s5 + $0xd8] sm:$0xff] }
 0x167   : > { %2077 = vmatmul.mubr.msk.f32.vlgmr.msra.gmra.mxu1 %vm428_vm3, %v1905_v25  ;;  %2099 = vmatprep.subr.mxu0 %v2322_v0  ;;  %v1948_v25 = vld [vmem:[%s2775_s5 + $0xe0] sm:$0xff] }
 0x168   : > { %2085 = vmatpush3.msra.mxu1 %v894_v26  ;;  %2086 = vmatprep.mubr.msk.f32.mxu1 %vm2323_vm0, %v2322_v0  ;;  %v1939_v26 = vld [vmem:[%s2775_s5 + $0xa8] sm:$0xff] }
 0x169   : > { %2094 = vmatprep.subr.mxu1 %v2322_v0  ;;  %2092 = vmatmul.mubr.msk.f32.vlgmr.msra.gmra.mxu0 %vm428_vm3, %v1911_v28  ;;  %v1938_v28 = vld [vmem:[%s2775_s5 + $0xa0] sm:$0xff] }
 0x16a   : > { %2109 = vmatprep.mubr.msk.f32.mxu0 %vm2323_vm0, %v2322_v0  ;;  %2100 = vmatpush3.msk.msra.mxu0 %vm1146_vm4, %v1141_v32  ;;  %v1956_v32 = vld [vmem:[%s2775_s5 + $0x110] sm:$0x7] }
 0x16b   : > { %2087 = vmatmul.mubr.msk.f32.vlgmr.msra.gmra.mxu1 %vm428_vm3, %v1909_v29  ;;  %2101 = vmatprep.subr.mxu0 %v2322_v0  ;;  %v1946_v29 = vld [vmem:[%s2775_s5 + $0xd0] sm:$0xff] }
 0x16c   : > { %2095 = vmatpush3.msra.mxu1 %v1052_v30  ;;  %2096 = vmatprep.mubr.msk.f32.mxu1 %vm2323_vm0, %v2322_v0 }
 0x16d   : > { %2112 = vmatprep.subr.mxu1 %v2322_v0  ;;  %2102 = vmatpush3.msra.mxu0 %v1140_v33 }
 0x16e   : > { %2103 = vmatprep.subr.mxu0 %v2322_v0 }
 0x16f   : > { %2097 = vmatmul.mubr.msk.f32.vlgmr.msra.gmra.mxu1 %vm428_vm3, %v1913_v31  ;;  %2104 = vmatpush3.msra.mxu0 %v1139_v35  ;;  %v1945_v31 = vld [vmem:[%s2775_s5 + $0xc8] sm:$0xff]  ;;  %v1963_v35 = vld [vmem:[%s2775_s5 + $0x138] sm:$0x7] }
 0x170   : > { %2122 = vmatprep.mubr.msk.f32.mxu1 %vm2323_vm0, %v2322_v0  ;;  %2113 = vmatpush3.msk.msra.mxu1 %vm1146_vm4, %v1921_v34  ;;  %v1955_v34 = vld [vmem:[%s2775_s5 + $0x108] sm:$0xff] }
 0x171   : > { %2114 = vmatprep.subr.mxu1 %v2322_v0  ;;  %2105 = vmatprep.subr.mxu0 %v2322_v0 }
 0x172   : > { %2115 = vmatpush3.msra.mxu1 %v1920_v36  ;;  %2106 = vmatpush3.msra.mxu0 %v1138_v37  ;;  %v1132_v3 = vpop.permute.xlu1 %1131  ;;  %v1954_v36 = vld [vmem:[%s2775_s5 + $0x100] sm:$0xff]  ;;  %v1962_v37 = vld [vmem:[%s2775_s5 + $0x130] sm:$0xff] }
 0x173   : > { %2116 = vmatprep.subr.mxu1 %v2322_v0  ;;  %2107 = vmatprep.subr.mxu0 %v2322_v0 }
 0x174   : > { %2117 = vmatpush3.msra.mxu1 %v1919_v38  ;;  %2108 = vmatpush3.msra.mxu0 %v1137_v39  ;;  %v1953_v38 = vld [vmem:[%s2775_s5 + $0xf8] sm:$0xff]  ;;  %v1961_v39 = vld [vmem:[%s2775_s5 + $0x128] sm:$0xff] }
 0x175   : > { %2118 = vmatprep.subr.mxu1 %v2322_v0  ;;  %2125 = vmatprep.subr.mxu0 %v2322_v0 }
 0x176   : > { %2119 = vmatpush3.msra.mxu1 %v1918_v40  ;;  %v1952_v40 = vld [vmem:[%s2775_s5 + $0xf0] sm:$0xff] }
 0x177   : > { %2120 = vmatprep.subr.mxu1 %v2322_v0 }
 0x178   : > { %2121 = vmatpush3.msra.mxu1 %v1917_v41  ;;  %v1960_v41 = vld [vmem:[%s2775_s5 + $0x120] sm:$0xff] }
 0x179   : > { %2138 = vmatprep.subr.mxu1 %v2322_v0 }
 0x21b   : > { %v498_v42 = vpop.f32.mrf.mxu1 }
 0x21d   : > { %v2058_v43 = vpop.f32.mrf.mxu1 }
 0x21e   : > { %v1959_v43 = vld [vmem:[%s2775_s5 + $0x118] sm:$0xff] }
 0x21f   : > { %v571_v44 = vpop.f32.mrf.mxu1 }
 0x220   : > { %v572_v47 = vadd.f32 %v571_v44, %v498_v42 }
 0x221   : > { %v2063_v45 = vpop.f32.mrf.mxu1  ;;  %v728_v46 = vpop.f32.mrf.mxu0 }
 0x223   : > { %v649_v48 = vpop.f32.mrf.mxu1  ;;  %v2073_v49 = vpop.f32.mrf.mxu0 }
 0x224   : > { %v653_v50 = vadd.f32 %v649_v48, %v572_v47 }
 0x225   : > { %v2068_v51 = vpop.f32.mrf.mxu1  ;;  %v886_v52 = vpop.f32.mrf.mxu0 }
 0x226   : > { %v732_v53 = vadd.f32 %v728_v46, %v653_v50 }
 0x227   : > { %v807_v54 = vpop.f32.mrf.mxu1  ;;  %v2083_v55 = vpop.f32.mrf.mxu0 }
 0x228   : > { %v811_v56 = vadd.f32 %v807_v54, %v732_v53 }
 0x229   : > { %v2078_v57 = vpop.f32.mrf.mxu1  ;;  %v1044_v58 = vpop.f32.mrf.mxu0 }
 0x22a   : > { %v890_v59 = vadd.f32 %v886_v52, %v811_v56  ;;  %v1136_v52 = vld [vmem:[%s2776_s6] sm:$0x1] }
 0x22b   : > { %v965_v60 = vpop.f32.mrf.mxu1  ;;  %v2093_v61 = vpop.f32.mrf.mxu0 }
 0x22c   : > { %v969_v62 = vadd.f32 %v965_v60, %v890_v59 }
 0x22d   : > { %v2088_v63 = vpop.f32.mrf.mxu1 }
 0x22e   : > { %v1048_v1 = vadd.f32 %v1044_v58, %v969_v62 }
 0x22f   : > { %v1123_v2 = vpop.f32.mrf.mxu1 }
 0x230   : > { %v1127_v4 = vadd.f32 %v1123_v2, %v1048_v1 }
 0x231   : > { %v2098_v5 = vpop.f32.mrf.mxu1 }
 0x232   : > { %v1134_v6 = vadd.f32 %v1132_v3, %v1127_v4 }
 0x234   : > { %v2564_v7 = vmax.f32 %v1134_v6, 0.0 }
 0x236   : > { %2110 = vmatmul.mubr.msk.f32.vlgmr.msra.gmra.mxu0 %vm1142_vm5, %v2564_v7  ;;  %v1227_v9 = vrot.slane %v2564_v7, 1  ;;  %v1310_v18 = vrot.slane %v2564_v7, 2  ;;  %v1393_v21 = vrot.slane %v2564_v7, 3  ;;  %v1476_v30 = vrot.slane %v2564_v7, 4 }
 0x237   : > { %2126 = vmatpush3.msk.msra.mxu0 %vm1146_vm4, %v1928_v8  ;;  %2135 = vmatprep.mubr.msk.f32.mxu0 %vm2323_vm0, %v2322_v0  ;;  %v1559_v33 = vrot.slane %v2564_v7, 5  ;;  %v1642_v42 = vrot.slane %v2564_v7, 6  ;;  %v1725_v44 = vrot.slane %v2564_v7, 7 }
 0x238   : > { %2127 = vmatprep.subr.mxu0 %v2322_v0  ;;  %2123 = vmatmul.mubr.msk.f32.vlgmr.msra.gmra.mxu1 %vm1142_vm5, %v1227_v9 }
 0x239   : > { %2128 = vmatpush3.msra.mxu0 %v1927_v10  ;;  %2139 = vmatpush3.msk.msra.mxu1 %vm1146_vm4, %v1935_v11 }
 0x23a   : > { %2129 = vmatprep.subr.mxu0 %v2322_v0  ;;  %2140 = vmatprep.subr.mxu1 %v2322_v0 }
 0x23b   : > { %2130 = vmatpush3.msra.mxu0 %v1926_v12  ;;  %2141 = vmatpush3.msra.mxu1 %v1934_v13 }
 0x23c   : > { %2131 = vmatprep.subr.mxu0 %v2322_v0  ;;  %2142 = vmatprep.subr.mxu1 %v2322_v0 }
 0x23d   : > { %2132 = vmatpush3.msra.mxu0 %v1925_v14  ;;  %2143 = vmatpush3.msra.mxu1 %v1933_v15 }
 0x23e   : > { %2133 = vmatprep.subr.mxu0 %v2322_v0  ;;  %2144 = vmatprep.subr.mxu1 %v2322_v0 }
 0x23f   : > { %2134 = vmatpush3.msra.mxu0 %v1924_v16  ;;  %2145 = vmatpush3.msra.mxu1 %v1932_v17  ;;  %v1817_v16 = vld [vmem:[%s2777_s7] sm:$0x1] }
 0x240   : > { %2136 = vmatmul.mubr.msk.f32.vlgmr.msra.gmra.mxu0 %vm1142_vm5, %v1310_v18  ;;  %2146 = vmatprep.subr.mxu1 %v2322_v0  ;;  %v1819_v18 = vld [vmem:[%s2778_s8] sm:$0x1] }
 0x241   : > { %2151 = vmatprep.subr.mxu0 %v2322_v0  ;;  %2147 = vmatpush3.msra.mxu1 %v1931_v19 }
 0x242   : > { %2148 = vmatprep.mubr.msk.f32.mxu1 %vm2323_vm0, %v2322_v0  ;;  %2152 = vmatpush3.msk.msra.mxu0 %vm1146_vm4, %v1942_v20 }
 0x243   : > { %2149 = vmatmul.mubr.msk.f32.vlgmr.msra.gmra.mxu1 %vm1142_vm5, %v1393_v21  ;;  %2153 = vmatprep.subr.mxu0 %v2322_v0 }
 0x244   : > { %2164 = vmatprep.subr.mxu1 %v2322_v0  ;;  %2154 = vmatpush3.msra.mxu0 %v1941_v22 }
 0x245   : > { %2165 = vmatpush3.msk.msra.mxu1 %vm1146_vm4, %v1949_v23  ;;  %2155 = vmatprep.subr.mxu0 %v2322_v0 }
 0x246   : > { %2166 = vmatprep.subr.mxu1 %v2322_v0  ;;  %2156 = vmatpush3.msra.mxu0 %v1940_v24 }
 0x247   : > { %2167 = vmatpush3.msra.mxu1 %v1948_v25  ;;  %2157 = vmatprep.subr.mxu0 %v2322_v0 }
 0x248   : > { %2168 = vmatprep.subr.mxu1 %v2322_v0  ;;  %2158 = vmatpush3.msra.mxu0 %v1939_v26 }
 0x249   : > { %2169 = vmatpush3.msra.mxu1 %v1947_v27  ;;  %2159 = vmatprep.subr.mxu0 %v2322_v0 }
 0x24a   : > { %2170 = vmatprep.subr.mxu1 %v2322_v0  ;;  %2160 = vmatpush3.msra.mxu0 %v1938_v28 }
 0x24b   : > { %2161 = vmatprep.mubr.msk.f32.mxu0 %vm2323_vm0, %v2322_v0  ;;  %2171 = vmatpush3.msra.mxu1 %v1946_v29 }
 0x24c   : > { %2162 = vmatmul.mubr.msk.f32.vlgmr.msra.gmra.mxu0 %vm1142_vm5, %v1476_v30  ;;  %2172 = vmatprep.subr.mxu1 %v2322_v0 }
 0x24d   : > { %2177 = vmatprep.subr.mxu0 %v2322_v0  ;;  %2173 = vmatpush3.msra.mxu1 %v1945_v31 }
 0x24e   : > { %2174 = vmatprep.mubr.msk.f32.mxu1 %vm2323_vm0, %v2322_v0  ;;  %2178 = vmatpush3.msk.msra.mxu0 %vm1146_vm4, %v1956_v32 }
 0x24f   : > { %2175 = vmatmul.mubr.msk.f32.vlgmr.msra.gmra.mxu1 %vm1142_vm5, %v1559_v33  ;;  %2179 = vmatprep.subr.mxu0 %v2322_v0 }
 0x250   : > { %2190 = vmatprep.subr.mxu1 %v2322_v0  ;;  %2180 = vmatpush3.msra.mxu0 %v1955_v34 }
 0x251   : > { %2191 = vmatpush3.msk.msra.mxu1 %vm1146_vm4, %v1963_v35  ;;  %2181 = vmatprep.subr.mxu0 %v2322_v0 }
 0x252   : > { %2192 = vmatprep.subr.mxu1 %v2322_v0  ;;  %2182 = vmatpush3.msra.mxu0 %v1954_v36 }
 0x253   : > { %2193 = vmatpush3.msra.mxu1 %v1962_v37  ;;  %2183 = vmatprep.subr.mxu0 %v2322_v0 }
 0x254   : > { %2194 = vmatprep.subr.mxu1 %v2322_v0  ;;  %2184 = vmatpush3.msra.mxu0 %v1953_v38 }
 0x255   : > { %2195 = vmatpush3.msra.mxu1 %v1961_v39  ;;  %2185 = vmatprep.subr.mxu0 %v2322_v0 }
 0x256   : > { %2196 = vmatprep.subr.mxu1 %v2322_v0  ;;  %2186 = vmatpush3.msra.mxu0 %v1952_v40 }
 0x257   : > { %2187 = vmatprep.mubr.msk.f32.mxu0 %vm2323_vm0, %v2322_v0  ;;  %2197 = vmatpush3.msra.mxu1 %v1960_v41 }
 0x258   : > { %2188 = vmatmul.mubr.msk.f32.vlgmr.msra.gmra.mxu0 %vm1142_vm5, %v1642_v42  ;;  %2198 = vmatprep.subr.mxu1 %v2322_v0 }
 0x259   : > { %2199 = vmatpush3.msra.mxu1 %v1959_v43  ;;  %2200 = vmatprep.mubr.msk.f32.mxu1 %vm2323_vm0, %v2322_v0 }
 0x25a   : > { %2201 = vmatmul.mubr.msk.f32.vlgmr.msra.gmra.mxu1 %vm1142_vm5, %v1725_v44 }
 0x2f6   : > { %v1216_v45 = vpop.f32.mrf.mxu0 }
 0x2f7   : > { %v1220_v54 = vadd.f32 %v1216_v45, %v1136_v52 }
 0x2f8   : > { %v2111_v46 = vpop.f32.mrf.mxu0  ;;  %v1299_v47 = vpop.f32.mrf.mxu1 }
 0x2f9   : > { %v1303_v55 = vadd.f32 %v1299_v47, %v1220_v54 }
 0x2fa   : > { %v2124_v48 = vpop.f32.mrf.mxu1 }
 0x300   : > { %v1382_v49 = vpop.f32.mrf.mxu0 }
 0x301   : > { %v1386_v57 = vadd.f32 %v1382_v49, %v1303_v55 }
 0x302   : > { %v2137_v50 = vpop.f32.mrf.mxu0 }
 0x303   : > { %v1465_v51 = vpop.f32.mrf.mxu1 }
 0x304   : > { %v1469_v59 = vadd.f32 %v1465_v51, %v1386_v57 }
 0x305   : > { %v2150_v53 = vpop.f32.mrf.mxu1 }
 0x30c   : > { %v1548_v56 = vpop.f32.mrf.mxu0 }
 0x30d   : > { %v1552_v61 = vadd.f32 %v1548_v56, %v1469_v59 }
 0x30e   : > { %v2163_v58 = vpop.f32.mrf.mxu0 }
 0x30f   : > { %v1631_v0 = vpop.f32.mrf.mxu1 }
 0x310   : > { %v1635_v62 = vadd.f32 %v1631_v0, %v1552_v61 }
 0x311   : > { %v2176_v60 = vpop.f32.mrf.mxu1 }
 0x318   : > { %v1714_v63 = vpop.f32.mrf.mxu0 }
 0x319   : > { %v1718_v1 = vadd.f32 %v1714_v63, %v1635_v62 }
 0x31a   : > { %v2189_v2 = vpop.f32.mrf.mxu0  ;;  %v1797_v3 = vpop.f32.mrf.mxu1 }
 0x31b   : > { %v1801_v4 = vadd.f32 %v1797_v3, %v1718_v1 }
 0x31c   : > { %v2202_v5 = vpop.f32.mrf.mxu1 }
 0x31d   : > { %v1803_v6 = vsel %vm1802_vm6, %v1801_v4, 0.0 }
 0x31e   : > { %1804 = vadd.xlane.f32.xlu0 %v1803_v6 }
 0x3a7   : > { %v1805_v7 = vpop.xlane.xlu0 %1804 }
 0x3a8   : > { %v1807_v8 = vmul.f32 0.03125, %v1805_v7 }
 0x3aa   : > { %v1808_v9 = vsub.f32 %v1801_v4, %v1807_v8 }
 0x3ac   : > { %v1809_v10 = vmul.f32 %v1808_v9, %v1808_v9 }
 0x3ae   : > { %v1810_v11 = vsel %vm1802_vm6, %v1809_v10, 0.0 }
 0x3af   : > { %1811 = vadd.xlane.f32.xlu1 %v1810_v11 }
 0x438   : > { %v1812_v12 = vpop.xlane.xlu1 %1811 }
 0x439   : > { %v1813_v13 = vmul.f32 0.03125, %v1812_v12 }
 0x43b   : > { %v1814_v14 = vadd.f32 1e-05, %v1813_v13 }
 0x43d   : > { %2256 = vrsqrt.f32 %v1814_v14 }
 0x44a   : > { %v2257_v15 = vpop.eup %2256 }
 0x44b   : > { %v1816_v17 = vmul.f32 %v2257_v15, %v1808_v9 }
 0x44d   : > { %v1818_v19 = vmul.f32 %v1817_v16, %v1816_v17 }
 0x44f   : > { %v1820_v20 = vadd.f32 %v1819_v18, %v1818_v19 }
 0x451   : > { %2258 = vtanh.f32 %v1820_v20 }
 0x45e   : > { %v2259_v21 = vpop.eup %2258 }
 0x45f   : > { %1822 = vst.msk [vmem:[%s324_s26] sm:$0x1] %vm1802_vm6, %v2259_v21 }
 0x460   : > { %2273 = shalt.err (!%p2270_p3)
}
 0x461   : > { %s2274_s23 = scalar_lea.hbm %s2734_s14, 16  ;;  %s2278_s26 = scalar_lea.hbm %s2779_s9, 32 }
 0x462   : > { %p2275_p4 = scmp.ne.s32.totalorder %s2734_s14, %s2274_s23  ;;  %p2279_p9 = scmp.lt.s32.totalorder %s2734_s14, %s2779_s9 }
 0x463   : > { %p2280_p10 = scmp.lt.s32.totalorder %s2278_s26, %s2274_s23 }
 0x464   : > { %p2276_p7 = pnand %p2275_p4, %p2422_p5 }
 0x465   : > { %p2281_p11 = por %p2280_p10, %p2279_p9 }
 0x466   : > { %p2277_p8 = pneg %p2276_p7 }
 0x468   : > { %p2282_p12 = pnand %p2281_p11, %p2277_p8 }
 0x46a   : > { %2285 = shalt.err (!%p2282_p12)
}
 0x46b   : > { %2204 = dma.vmem_to_hbm [thread:$0]  (%p2422_p5), %s1837_s27, 16, %s2734_s14, %s1824_s16  }
 0x46c PF: > { %p2210_p13 = scmp.ge.s32.totalorder %s2320_s12, 2  ;;  %s1848_s17 = sand.u32 1, %s2308_s30  }
 0x46d   : > { %s1849_s21 = scalar_lea.sflag [#allocation3], %s1848_s17 }
 0x46e   : > { %p2207_p0 = pnand %p2210_p13, %p2426_p6 }
 0x470   : > { %p2208_p1 = pneg %p2207_p0 }
 0x472   : > { %2303 = dma.done.wait (%p2208_p1), %s1849_s21, 16  }
 0x473   : > { %2305 = vsyncadd (%p2208_p1), %s1849_s21, 4294967280  ;;  %p19_p2 = scmp.ge.s32.totalorder %s2409_s15, 4   ;;  %s2782_s30 = smov %s2312_s10 }
 0x474   : > { %s2783_s10 = smov %s2316_s11  ;;  %s2784_s11 = smov %s2420_s18 }
 0x475   : > { %s2785_s12 = smov %s2409_s15  ;;  %21 = sbr.rel (!%p19_p2) target bundleno = 3 (0x3), region = 106 }
 0x47a   :  { %1853 = vsyncpa [#allocation3], 1 }
 0x47b   :  { %1855 = vsyncpa [#allocation3 + $0x1], 1 }

</bundles_post_ra>
